<compile_context>
chip_gen: v6e
topology: v6e:2x2x1
jax: 0.10.0
libtpu: 0.0.40
codegen_flags: <defaults>
</compile_context>

<pallas_src>
import functools

import jax
import jax.numpy as jnp
from jax.experimental import pallas as pl
from jax.experimental.pallas import tpu as pltpu

_LANES = 128
_SUBLANES = 8


def _round_up(x, m):
    return -(-x // m) * m


# --------------------------------------------------------------------------
# Kernel: one controlled semi-implicit Euler step over a lane-dense row tile.
#   f      = sum_k a[k] * W[k]                      (VPU broadcast-FMA, a in SMEM)
#   v'     = v*(1-damping) + dt*(1-damping)*g + dt*(1-damping)*f
#   x'     = x + dt * v'
# --------------------------------------------------------------------------
def _sim_step_kernel(a_ref, x_ref, v_ref, w_ref, gterm_ref,
                     x_out_ref, v_out_ref, *,
                     n_actions, dt, vel_scale, frc_scale):
    # Control force as a K-deep scalar*vector FMA (K tiny -> unrolled at trace
    # time).  Keeps the MXU idle; the kernel is purely VPU / memory bound.
    f = a_ref[0, 0] * w_ref[0]
    for k in range(1, n_actions):
        f = f + a_ref[0, k] * w_ref[k]

    # v' = (v + dt*(g + f)) * (1 - damping), constants folded on the host.
    v_new = v_ref[...] * vel_scale + gterm_ref[...] + f * frc_scale
    x_new = x_ref[...] + dt * v_new

    v_out_ref[...] = v_new
    x_out_ref[...] = x_new


def _sim_step(x, v, a, w_tiled, gterm_tiled, *,
              n_particles, n_actions, rows, tile_rows, dt, damping):
    """x, v: (N, 3); a: (K,); w_tiled: (K, rows, 128); gterm_tiled: (rows, 128)."""
    d = 3 * n_particles
    d_pad = rows * _LANES
    pad = d_pad - d

    x_t = jnp.pad(jnp.reshape(x.astype(jnp.float32), (d,)), (0, pad)
                  ).reshape(rows, _LANES)
    v_t = jnp.pad(jnp.reshape(v.astype(jnp.float32), (d,)), (0, pad)
                  ).reshape(rows, _LANES)
    a_row = jnp.reshape(a.astype(jnp.float32), (1, n_actions))

    vel_scale = 1.0 - damping
    frc_scale = dt * vel_scale

    kernel = functools.partial(
        _sim_step_kernel, n_actions=n_actions, dt=dt,
        vel_scale=vel_scale, frc_scale=frc_scale)

    row_spec = pl.BlockSpec((tile_rows, _LANES), lambda i: (i, 0))
    w_spec = pl.BlockSpec((n_actions, tile_rows, _LANES), lambda i: (0, i, 0))

    x_new, v_new = pl.pallas_call(
        kernel,
        out_shape=(jax.ShapeDtypeStruct((rows, _LANES), jnp.float32),
                   jax.ShapeDtypeStruct((rows, _LANES), jnp.float32)),
        grid=(rows // tile_rows,),
        in_specs=[
            pl.BlockSpec(memory_space=pltpu.MemorySpace.SMEM),  # action (1, K)
            row_spec,                                           # x
            row_spec,                                           # v
            w_spec,                                             # W
            row_spec,                                           # dt*(1-damping)*g
        ],
        out_specs=(row_spec, row_spec),
        compiler_params=pltpu.CompilerParams(
            dimension_semantics=("parallel",)),
    )(a_row, x_t, v_t, w_tiled, gterm_tiled)

    x_out = x_new.reshape(d_pad)[:d].reshape(n_particles, 3)
    v_out = v_new.reshape(d_pad)[:d].reshape(n_particles, 3)
    return x_out, v_out


class PySimPallas:
    """JAX/Pallas analogue of pySim: forward(x, v, a) -> (x', v')."""

    def __init__(self, n_particles, n_actions, *, dt=1.0 / 90.0, damping=0.01,
                 use_fixed_point=False, seed=0, max_tile_rows=256):
        self.n_particles = n_particles
        self.n_actions = n_actions
        self.dt = float(dt)
        self.damping = float(damping)
        self.use_fixed_point = use_fixed_point  # kept for API parity

        D = 3 * n_particles
        # lane/sublane-dense layout: rows of 128 lanes; rows a multiple of the
        # tile size (itself a multiple of 8 sublanes).  max_tile_rows=256 keeps
        # per-step VMEM modest (~128 KiB/state tile, K*128 KiB for W) so it is
        # safe under v7x's smaller VMEM while still hitting the HBM roofline.
        rows = _round_up(max(1, -(-D // _LANES)), _SUBLANES)
        tile_rows = min(rows, max_tile_rows)
        rows = _round_up(rows, tile_rows)
        self.rows = rows
        self.tile_rows = tile_rows
        d_pad = rows * _LANES

        key = jax.random.PRNGKey(seed)
        # deterministic "simulation parameters": control-to-force map + gravity
        self.W = jax.random.normal(key, (n_actions, D), dtype=jnp.float32) * 0.1
        self.g = jnp.tile(jnp.array([0.0, -9.8, 0.0], jnp.float32), (n_particles,))

        # pre-tiled, zero-padded kernel operands (padding stays exactly zero
        # through the update, and the wrapper slices it off afterwards).
        self.W_tiled = jnp.pad(self.W, ((0, 0), (0, d_pad - D))
                               ).reshape(n_actions, rows, _LANES)
        gterm = self.dt * (1.0 - self.damping) * self.g
        self.gterm_tiled = jnp.pad(gterm, (0, d_pad - D)).reshape(rows, _LANES)

        self._step = jax.jit(functools.partial(
            _sim_step, n_particles=n_particles, n_actions=n_actions,
            rows=rows, tile_rows=tile_rows, dt=self.dt, damping=self.damping))

    def forward(self, x, v, a):
        """x, v: (N, 3) f32 positions / velocities; a: (K,) f32 action."""
        x = jnp.asarray(x, jnp.float32)
        v = jnp.asarray(v, jnp.float32)
        a = jnp.asarray(a, jnp.float32)
        return self._step(x, v, a, self.W_tiled, self.gterm_tiled)

    __call__ = forward


if __name__ == "__main__":
    N_PARTICLES = 16   # 16 cloth vertices -> state dim 48
    N_ACTIONS = 8

    key = jax.random.PRNGKey(0)
    kx, kv, ka = jax.random.split(key, 3)
    x0 = jax.random.normal(kx, (N_PARTICLES, 3), dtype=jnp.float32)
    v0 = jax.random.normal(kv, (N_PARTICLES, 3), dtype=jnp.float32) * 0.1
    a0 = jax.random.normal(ka, (N_ACTIONS,), dtype=jnp.float32)

    sim = PySimPallas(N_PARTICLES, N_ACTIONS, use_fixed_point=False, seed=0)
    x1, v1 = sim(x0, v0, a0)
    jax.block_until_ready((x1, v1))

    # plain-JAX reference for one controlled semi-implicit Euler step
    D = 3 * N_PARTICLES
    f = (a0.reshape(1, -1) @ sim.W).reshape(D)
    v_ref = (v0.reshape(D) + sim.dt * (sim.g + f)) * (1.0 - sim.damping)
    x_ref = x0.reshape(D) + sim.dt * v_ref
    assert jnp.allclose(v1.reshape(D), v_ref, atol=1e-5), "velocity mismatch"
    assert jnp.allclose(x1.reshape(D), x_ref, atol=1e-5), "position mismatch"

    print("KERNEL_OK")
</pallas_src>

<mosaic_0001>
module attributes {stable_mosaic.version = 11 : i64} {
  func.func @_sim_step_kernel(%arg0: i32, %arg1: memref<1x8xf32, #tpu.memory_space<smem>>, %arg2: memref<8x128xf32, #tpu.memory_space<vmem>>, %arg3: memref<8x128xf32, #tpu.memory_space<vmem>>, %arg4: memref<8x8x128xf32, #tpu.memory_space<vmem>>, %arg5: memref<8x128xf32, #tpu.memory_space<vmem>>, %arg6: memref<8x128xf32, #tpu.memory_space<vmem>>, %arg7: memref<8x128xf32, #tpu.memory_space<vmem>>) attributes {dimension_semantics = [#tpu.dimension_semantics<parallel>], iteration_bounds = array<i64: 1>, scalar_prefetch = 0 : i64, scratch_operands = 0 : i64, tpu.core_type = #tpu.core_type<tc>, window_params = [{transform_indices = @transform_0, window_bounds = array<i64: 1, 8>}, {transform_indices = @transform_1, window_bounds = array<i64: 8, 128>}, {transform_indices = @transform_2, window_bounds = array<i64: 8, 128>}, {transform_indices = @transform_3, window_bounds = array<i64: 8, 8, 128>}, {transform_indices = @transform_4, window_bounds = array<i64: 8, 128>}, {transform_indices = @transform_5, window_bounds = array<i64: 8, 128>}, {transform_indices = @transform_6, window_bounds = array<i64: 8, 128>}]} {
    %c0 = arith.constant 0 : index
    %c0_0 = arith.constant 0 : index
    %0 = memref.load %arg1[%c0, %c0_0] : memref<1x8xf32, #tpu.memory_space<smem>>
    %c0_1 = arith.constant 0 : index
    %c0_2 = arith.constant 0 : index
    %c0_3 = arith.constant 0 : index
    %1 = vector.load %arg4[%c0_1, %c0_2, %c0_3] : memref<8x8x128xf32, #tpu.memory_space<vmem>>, vector<1x8x128xf32>
    %2 = vector.shape_cast %1 : vector<1x8x128xf32> to vector<8x128xf32>
    %3 = vector.broadcast %0 : f32 to vector<8x128xf32>
    %4 = arith.mulf %3, %2 : vector<8x128xf32>
    %c0_4 = arith.constant 0 : index
    %c1 = arith.constant 1 : index
    %5 = memref.load %arg1[%c0_4, %c1] : memref<1x8xf32, #tpu.memory_space<smem>>
    %c1_5 = arith.constant 1 : index
    %c0_6 = arith.constant 0 : index
    %c0_7 = arith.constant 0 : index
    %6 = vector.load %arg4[%c1_5, %c0_6, %c0_7] : memref<8x8x128xf32, #tpu.memory_space<vmem>>, vector<1x8x128xf32>
    %7 = vector.shape_cast %6 : vector<1x8x128xf32> to vector<8x128xf32>
    %8 = vector.broadcast %5 : f32 to vector<8x128xf32>
    %9 = arith.mulf %8, %7 : vector<8x128xf32>
    %10 = arith.addf %4, %9 : vector<8x128xf32>
    %c0_8 = arith.constant 0 : index
    %c2 = arith.constant 2 : index
    %11 = memref.load %arg1[%c0_8, %c2] : memref<1x8xf32, #tpu.memory_space<smem>>
    %c2_9 = arith.constant 2 : index
    %c0_10 = arith.constant 0 : index
    %c0_11 = arith.constant 0 : index
    %12 = vector.load %arg4[%c2_9, %c0_10, %c0_11] : memref<8x8x128xf32, #tpu.memory_space<vmem>>, vector<1x8x128xf32>
    %13 = vector.shape_cast %12 : vector<1x8x128xf32> to vector<8x128xf32>
    %14 = vector.broadcast %11 : f32 to vector<8x128xf32>
    %15 = arith.mulf %14, %13 : vector<8x128xf32>
    %16 = arith.addf %10, %15 : vector<8x128xf32>
    %c0_12 = arith.constant 0 : index
    %c3 = arith.constant 3 : index
    %17 = memref.load %arg1[%c0_12, %c3] : memref<1x8xf32, #tpu.memory_space<smem>>
    %c3_13 = arith.constant 3 : index
    %c0_14 = arith.constant 0 : index
    %c0_15 = arith.constant 0 : index
    %18 = vector.load %arg4[%c3_13, %c0_14, %c0_15] : memref<8x8x128xf32, #tpu.memory_space<vmem>>, vector<1x8x128xf32>
    %19 = vector.shape_cast %18 : vector<1x8x128xf32> to vector<8x128xf32>
    %20 = vector.broadcast %17 : f32 to vector<8x128xf32>
    %21 = arith.mulf %20, %19 : vector<8x128xf32>
    %22 = arith.addf %16, %21 : vector<8x128xf32>
    %c0_16 = arith.constant 0 : index
    %c4 = arith.constant 4 : index
    %23 = memref.load %arg1[%c0_16, %c4] : memref<1x8xf32, #tpu.memory_space<smem>>
    %c4_17 = arith.constant 4 : index
    %c0_18 = arith.constant 0 : index
    %c0_19 = arith.constant 0 : index
    %24 = vector.load %arg4[%c4_17, %c0_18, %c0_19] : memref<8x8x128xf32, #tpu.memory_space<vmem>>, vector<1x8x128xf32>
    %25 = vector.shape_cast %24 : vector<1x8x128xf32> to vector<8x128xf32>
    %26 = vector.broadcast %23 : f32 to vector<8x128xf32>
    %27 = arith.mulf %26, %25 : vector<8x128xf32>
    %28 = arith.addf %22, %27 : vector<8x128xf32>
    %c0_20 = arith.constant 0 : index
    %c5 = arith.constant 5 : index
    %29 = memref.load %arg1[%c0_20, %c5] : memref<1x8xf32, #tpu.memory_space<smem>>
    %c5_21 = arith.constant 5 : index
    %c0_22 = arith.constant 0 : index
    %c0_23 = arith.constant 0 : index
    %30 = vector.load %arg4[%c5_21, %c0_22, %c0_23] : memref<8x8x128xf32, #tpu.memory_space<vmem>>, vector<1x8x128xf32>
    %31 = vector.shape_cast %30 : vector<1x8x128xf32> to vector<8x128xf32>
    %32 = vector.broadcast %29 : f32 to vector<8x128xf32>
    %33 = arith.mulf %32, %31 : vector<8x128xf32>
    %34 = arith.addf %28, %33 : vector<8x128xf32>
    %c0_24 = arith.constant 0 : index
    %c6 = arith.constant 6 : index
    %35 = memref.load %arg1[%c0_24, %c6] : memref<1x8xf32, #tpu.memory_space<smem>>
    %c6_25 = arith.constant 6 : index
    %c0_26 = arith.constant 0 : index
    %c0_27 = arith.constant 0 : index
    %36 = vector.load %arg4[%c6_25, %c0_26, %c0_27] : memref<8x8x128xf32, #tpu.memory_space<vmem>>, vector<1x8x128xf32>
    %37 = vector.shape_cast %36 : vector<1x8x128xf32> to vector<8x128xf32>
    %38 = vector.broadcast %35 : f32 to vector<8x128xf32>
    %39 = arith.mulf %38, %37 : vector<8x128xf32>
    %40 = arith.addf %34, %39 : vector<8x128xf32>
    %c0_28 = arith.constant 0 : index
    %c7 = arith.constant 7 : index
    %41 = memref.load %arg1[%c0_28, %c7] : memref<1x8xf32, #tpu.memory_space<smem>>
    %c7_29 = arith.constant 7 : index
    %c0_30 = arith.constant 0 : index
    %c0_31 = arith.constant 0 : index
    %42 = vector.load %arg4[%c7_29, %c0_30, %c0_31] : memref<8x8x128xf32, #tpu.memory_space<vmem>>, vector<1x8x128xf32>
    %43 = vector.shape_cast %42 : vector<1x8x128xf32> to vector<8x128xf32>
    %44 = vector.broadcast %41 : f32 to vector<8x128xf32>
    %45 = arith.mulf %44, %43 : vector<8x128xf32>
    %46 = arith.addf %40, %45 : vector<8x128xf32>
    %c0_32 = arith.constant 0 : index
    %c0_33 = arith.constant 0 : index
    %47 = vector.load %arg3[%c0_32, %c0_33] : memref<8x128xf32, #tpu.memory_space<vmem>>, vector<8x128xf32>
    %cst = arith.constant 9.900000e-01 : f32
    %48 = vector.broadcast %cst : f32 to vector<8x128xf32>
    %49 = arith.mulf %47, %48 : vector<8x128xf32>
    %c0_34 = arith.constant 0 : index
    %c0_35 = arith.constant 0 : index
    %50 = vector.load %arg5[%c0_34, %c0_35] : memref<8x128xf32, #tpu.memory_space<vmem>>, vector<8x128xf32>
    %51 = arith.addf %49, %50 : vector<8x128xf32>
    %cst_36 = arith.constant 1.100000e-02 : f32
    %52 = vector.broadcast %cst_36 : f32 to vector<8x128xf32>
    %53 = arith.mulf %46, %52 : vector<8x128xf32>
    %54 = arith.addf %51, %53 : vector<8x128xf32>
    %c0_37 = arith.constant 0 : index
    %c0_38 = arith.constant 0 : index
    %55 = vector.load %arg2[%c0_37, %c0_38] : memref<8x128xf32, #tpu.memory_space<vmem>>, vector<8x128xf32>
    %cst_39 = arith.constant 0.0111111114 : f32
    %56 = vector.broadcast %cst_39 : f32 to vector<8x128xf32>
    %57 = arith.mulf %56, %54 : vector<8x128xf32>
    %58 = arith.addf %55, %57 : vector<8x128xf32>
    %c0_40 = arith.constant 0 : index
    %c0_41 = arith.constant 0 : index
    %59 = vector.load %arg7[%c0_40, %c0_41] : memref<8x128xf32, #tpu.memory_space<vmem>>, vector<8x128xf32>
    tpu.vector_store %arg7[%c0_40, %c0_41], %54 {strides = array<i32>} : memref<8x128xf32, #tpu.memory_space<vmem>>, vector<8x128xf32>,
    %c0_42 = arith.constant 0 : index
    %c0_43 = arith.constant 0 : index
    %60 = vector.load %arg6[%c0_42, %c0_43] : memref<8x128xf32, #tpu.memory_space<vmem>>, vector<8x128xf32>
    tpu.vector_store %arg6[%c0_42, %c0_43], %58 {strides = array<i32>} : memref<8x128xf32, #tpu.memory_space<vmem>>, vector<8x128xf32>,
    return
  }
  func.func @transform_0(%arg0: i32) -> (i32, i32) {
    %c0_i32 = arith.constant 0 : i32
    %c0_i32_0 = arith.constant 0 : i32
    %c0_i32_1 = arith.constant 0 : i32
    return %c0_i32, %c0_i32_0 : i32, i32
  }
  func.func @transform_1(%arg0: i32) -> (i32, i32) {
    %c0_i32 = arith.constant 0 : i32
    %c0_i32_0 = arith.constant 0 : i32
    return %arg0, %c0_i32 : i32, i32
  }
  func.func @transform_2(%arg0: i32) -> (i32, i32) {
    %c0_i32 = arith.constant 0 : i32
    %c0_i32_0 = arith.constant 0 : i32
    return %arg0, %c0_i32 : i32, i32
  }
  func.func @transform_3(%arg0: i32) -> (i32, i32, i32) {
    %c0_i32 = arith.constant 0 : i32
    %c0_i32_0 = arith.constant 0 : i32
    %c0_i32_1 = arith.constant 0 : i32
    return %c0_i32, %arg0, %c0_i32_0 : i32, i32, i32
  }
  func.func @transform_4(%arg0: i32) -> (i32, i32) {
    %c0_i32 = arith.constant 0 : i32
    %c0_i32_0 = arith.constant 0 : i32
    return %arg0, %c0_i32 : i32, i32
  }
  func.func @transform_5(%arg0: i32) -> (i32, i32) {
    %c0_i32 = arith.constant 0 : i32
    %c0_i32_0 = arith.constant 0 : i32
    return %arg0, %c0_i32 : i32, i32
  }
  func.func @transform_6(%arg0: i32) -> (i32, i32) {
    %c0_i32 = arith.constant 0 : i32
    %c0_i32_0 = arith.constant 0 : i32
    return %arg0, %c0_i32 : i32, i32
  }
}

</mosaic_0001>

<bundles_post_ra>
// kernel: _sim_step.1
= control target key start
LH: loop header
LB: loop body
LE: loop exit
PB: predicated region body
PF: predicated region fallthrough
CT: control target
= control target key end

     0   :  { %12 = vsyncpa [#allocation3], 0  ;;  %s208_s0 = inlined_call_operand.vmem [shape: f32[1,8], index: 0, kind: input, shape index: {}]   ;;  %s209_s1 = inlined_call_operand.vmem [shape: f32[8,128], index: 1, kind: input, shape index: {}]   ;;  %s210_s2 = inlined_call_operand.vmem [shape: f32[8,128], index: 2, kind: input, shape index: {}]   ;;  %s211_s3 = inlined_call_operand.vmem [shape: f32[8,8,128], index: 3, kind: input, shape index: {}]   ;;  %s212_s4 = inlined_call_operand.vmem [shape: f32[8,128], index: 4, kind: input, shape index: {}]   ;;  %s213_s5 = inlined_call_operand.vmem [shape: f32[8,128], index: 5, kind: output, shape index: {0}]   ;;  %s214_s6 = inlined_call_operand.vmem [shape: f32[8,128], index: 6, kind: output, shape index: {1}]  }
   0x1   :  { %s19_s23 = sshll.u32 %s208_s0, 4  ;;  %s20_s23 = int_to_ptr.vmem [resolvable:$true] %s19_s23 }
   0x2   :  { %s116_s24 = scalar_lea.vmem %s20_s23, 16  ;;  %p121_p1 = scmp.lt.s32.totalorder %s20_s23, %s20_s23 }
   0x3   :  { %p117_p0 = scmp.ne.s32.totalorder %s20_s23, %s116_s24  ;;  %p122_p2 = scmp.lt.s32.totalorder %s116_s24, %s116_s24 }
   0x5   :  { %p123_p3 = por %p122_p2, %p121_p1 }
   0x7   :  { %p124_p4 = pnand %p123_p3, %p117_p0 }
   0x9   :  { %127 = shalt.err (!%p124_p4)
}
   0xa   :  { %s130_s25 = smov [#allocation2]  }
   0xb   :  { %22 = dma.vmem_to_smem %s20_s23, 16, %s130_s25, [#allocation3]  }
   0xc   :  { %128 = dma.done.wait [#allocation3], 16  }
   0xd   :  { %129 = vsyncadd [#allocation3], 4294967280 }
   0xe   :  { %34 = sfence }
   0xf   :  { %s35_s26 = sld [smem:[#allocation2]]  ;;  %v36_v0 = vld [vmem:[%s211_s3] sm:$0xff]  ;;  %v102_v1 = vld [vmem:[%s211_s3 + $0x8] sm:$0xff]  ;;  %v104_v3 = vld [vmem:[%s211_s3 + $0x10] sm:$0xff] }
  0x10   :  { %s101_s27 = sld [smem:[#allocation2 + $0x1]]  ;;  %v106_v6 = vld [vmem:[%s211_s3 + $0x18] sm:$0xff]  ;;  %v108_v11 = vld [vmem:[%s211_s3 + $0x20] sm:$0xff]  ;;  %v110_v15 = vld [vmem:[%s211_s3 + $0x28] sm:$0xff] }
  0x11   :  { %s103_s28 = sld [smem:[#allocation2 + $0x2]]  ;;  %v112_v19 = vld [vmem:[%s211_s3 + $0x30] sm:$0xff]  ;;  %v114_v23 = vld [vmem:[%s211_s3 + $0x38] sm:$0xff]  ;;  %v81_v25 = vld [vmem:[%s210_s2] sm:$0xff] }
  0x12   :  { %s105_s29 = sld [smem:[#allocation2 + $0x3]]  ;;  %v82_v30 = vmul.f32 0.99, %v81_v25  ;;  %v83_v31 = vld [vmem:[%s212_s4] sm:$0xff] }
  0x13   :  { %s107_s0 = sld [smem:[#allocation2 + $0x4]]  ;;  %v87_v37 = vld [vmem:[%s209_s1] sm:$0xff] }
  0x14   :  { %s109_s10 = sld [smem:[#allocation2 + $0x5]]  ;;  %v84_v34 = vadd.f32 %v83_v31, %v82_v30 }
  0x15   :  { %v37_v2 = vstv %s35_s26  ;;  %s111_s13 = sld [smem:[#allocation2 + $0x6]] }
  0x16   :  { %v38_v4 = vmul.f32 %v37_v2, %v36_v0  ;;  %v42_v5 = vstv %s101_s27  ;;  %s113_s16 = sld [smem:[#allocation2 + $0x7]] }
  0x17   :  { %v43_v7 = vmul.f32 %v102_v1, %v42_v5  ;;  %v48_v8 = vstv %s103_s28 }
  0x18   :  { %v49_v9 = vmul.f32 %v104_v3, %v48_v8  ;;  %v54_v10 = vstv %s105_s29 }
  0x19   :  { %v44_v12 = vadd.f32 %v43_v7, %v38_v4  ;;  %v55_v13 = vmul.f32 %v106_v6, %v54_v10  ;;  %v60_v14 = vstv %s107_s0 }
  0x1a   :  { %v66_v16 = vstv %s109_s10  ;;  %v61_v18 = vmul.f32 %v108_v11, %v60_v14 }
  0x1b   :  { %v50_v17 = vadd.f32 %v49_v9, %v44_v12  ;;  %v72_v20 = vstv %s111_s13  ;;  %v67_v22 = vmul.f32 %v110_v15, %v66_v16 }
  0x1c   :  { %v78_v24 = vstv %s113_s16  ;;  %v73_v27 = vmul.f32 %v112_v19, %v72_v20 }
  0x1d   :  { %v56_v21 = vadd.f32 %v55_v13, %v50_v17  ;;  %v79_v29 = vmul.f32 %v114_v23, %v78_v24 }
  0x1f   :  { %v62_v26 = vadd.f32 %v61_v18, %v56_v21 }
  0x21   :  { %v68_v28 = vadd.f32 %v67_v22, %v62_v26 }
  0x23   :  { %v74_v32 = vadd.f32 %v73_v27, %v68_v28 }
  0x25   :  { %v80_v33 = vadd.f32 %v79_v29, %v74_v32 }
  0x27   :  { %v85_v35 = vmul.f32 0.011, %v80_v33 }
  0x29   :  { %v86_v36 = vadd.f32 %v85_v35, %v84_v34 }
  0x2b   :  { %90 = vst [vmem:[%s214_s6] sm:$0xff] %v86_v36  ;;  %v88_v38 = vmul.f32 0.011111111, %v86_v36 }
  0x2d   :  { %v89_v39 = vadd.f32 %v88_v38, %v87_v37 }
  0x2f   :  { %91 = vst [vmem:[%s213_s5] sm:$0xff] %v89_v39 }
  0x30   :  { %100 = vsyncpa [#allocation3], 1 }

</bundles_post_ra>
